<compile_context>
chip_gen: v5e
topology: v5e:2x2
jax: 0.10.0
libtpu: 0.0.40
codegen_flags: <defaults>
</compile_context>

<pallas_src>
import jax
import jax.numpy as jnp
from jax.experimental import pallas as pl
from jax.experimental.pallas import tpu as pltpu

_LANES = 128
_SUBLANES = 8
_MAX_TILE_ROWS = 2048     # 2048 x 128 f32 = 1 MiB per input tile
_NUM_SPLITS = 2           # leading "parallel" grid axis (uses both TCs on v7x)
_PAD_LOGIT = -1e30        # sigmoid(_PAD_LOGIT) == 0 exactly in f32


def _cdiv(a, b):
    return -(-a // b)


def _dice_kernel(pred_ref, targ_ref, out_ref):
    i = pl.program_id(1)

    @pl.when(i == 0)
    def _():
        out_ref[...] = jnp.zeros_like(out_ref)

    p = jax.nn.sigmoid(pred_ref[...].astype(jnp.float32))
    t = targ_ref[...].astype(jnp.float32)

    # Fold the (tile_rows, 128) tile into an (8, 128) vreg-shaped partial:
    # pure VPU adds in the hot loop; cross-lane reduction is deferred to the
    # (tiny) wrapper epilogue.
    out_ref[0, 0] += jnp.sum((p * t).reshape(-1, _SUBLANES, _LANES), axis=0)
    out_ref[0, 1] += jnp.sum(p.reshape(-1, _SUBLANES, _LANES), axis=0)
    out_ref[0, 2] += jnp.sum(t.reshape(-1, _SUBLANES, _LANES), axis=0)


def dice_loss(prediction, target, smooth=1e-08):
    """Pallas implementation of DiceLoss.forward (arbitrary shapes, any smooth)."""
    assert prediction.shape == target.shape
    total = prediction.size

    rows = _cdiv(total, _LANES)
    rows_per_split = _cdiv(rows, _NUM_SPLITS)
    tile_rows = min(
        _MAX_TILE_ROWS,
        max(_SUBLANES, _cdiv(rows_per_split, _SUBLANES) * _SUBLANES),
    )
    inner = _cdiv(rows_per_split, tile_rows)
    padded_rows = _NUM_SPLITS * inner * tile_rows
    pad = padded_rows * _LANES - total

    pred_flat = prediction.reshape(-1)
    targ_flat = target.reshape(-1)
    if pad:
        # Padded prediction logits -> sigmoid == 0; padded targets == 0, so
        # padding contributes nothing to sum(p*t), sum(p) or sum(t).
        pred_flat = jnp.pad(pred_flat, (0, pad), constant_values=_PAD_LOGIT)
        targ_flat = jnp.pad(targ_flat, (0, pad), constant_values=0)
    pred2d = pred_flat.reshape(padded_rows, _LANES)
    targ2d = targ_flat.reshape(padded_rows, _LANES)

    partials = pl.pallas_call(
        _dice_kernel,
        out_shape=jax.ShapeDtypeStruct(
            (_NUM_SPLITS, 3, _SUBLANES, _LANES), jnp.float32),
        grid_spec=pltpu.PrefetchScalarGridSpec(
            num_scalar_prefetch=0,
            grid=(_NUM_SPLITS, inner),
            in_specs=[
                pl.BlockSpec((tile_rows, _LANES), lambda c, i: (c * inner + i, 0)),
                pl.BlockSpec((tile_rows, _LANES), lambda c, i: (c * inner + i, 0)),
            ],
            out_specs=pl.BlockSpec(
                (1, 3, _SUBLANES, _LANES), lambda c, i: (c, 0, 0, 0)),
        ),
        compiler_params=pltpu.CompilerParams(
            dimension_semantics=("parallel", "arbitrary"),
            vmem_limit_bytes=32 * 1024 * 1024,
        ),
    )(pred2d, targ2d)

    # Tiny epilogue on a (2, 3, 8, 128) array: combine per-core partials and
    # apply the dice formula with the caller-provided smooth (in f32).
    sums = jnp.sum(partials, axis=(0, 2, 3))   # [sum(p*t), sum(p), sum(t)]
    intersection = 2.0 * sums[0] + smooth
    union = sums[1] + sums[2] + smooth
    return 1.0 - intersection / union


def _reference_dice_loss(prediction, target, smooth=1e-08):
    p = jax.nn.sigmoid(prediction.astype(jnp.float32))
    t = target.astype(jnp.float32)
    intersection = 2.0 * jnp.sum(p * t) + smooth
    union = jnp.sum(p) + jnp.sum(t) + smooth
    return 1.0 - intersection / union


if __name__ == "__main__":
    key = jax.random.PRNGKey(0)
    k1, k2, k3, k4 = jax.random.split(key, 4)

    # NCHW, batch=2, channels=4, spatial=16x16 -> 2048 elements (16 x 128 slab)
    pred = jax.random.normal(k1, (2, 4, 16, 16), dtype=jnp.float32)
    targ = (jax.random.uniform(k2, (2, 4, 16, 16)) > 0.5).astype(jnp.float32)
    loss = dice_loss(pred, targ)
    jax.block_until_ready(loss)
    ref = _reference_dice_loss(pred, targ)
    assert jnp.allclose(loss, ref, atol=1e-5, rtol=1e-5), (loss, ref)

    # Ragged shape (not a multiple of 8*128) + non-default smooth: exercises
    # the wrapper-side padding and the smooth handling.
    pred_r = jax.random.normal(k3, (2, 3, 17, 19), dtype=jnp.float32)
    targ_r = (jax.random.uniform(k4, (2, 3, 17, 19)) > 0.5).astype(jnp.float32)
    loss_r = dice_loss(pred_r, targ_r, smooth=1e-4)
    jax.block_until_ready(loss_r)
    ref_r = _reference_dice_loss(pred_r, targ_r, smooth=1e-4)
    assert jnp.allclose(loss_r, ref_r, atol=1e-5, rtol=1e-5), (loss_r, ref_r)

    print("KERNEL_OK")
</pallas_src>

<mosaic_0001>
module attributes {stable_mosaic.version = 11 : i64} {
  func.func @_dice_kernel(%arg0: i32, %arg1: i32, %arg2: memref<8x128xf32, #tpu.memory_space<vmem>>, %arg3: memref<8x128xf32, #tpu.memory_space<vmem>>, %arg4: memref<1x3x8x128xf32, #tpu.memory_space<vmem>>) attributes {dimension_semantics = [#tpu.dimension_semantics<parallel>, #tpu.dimension_semantics<arbitrary>], iteration_bounds = array<i64: 2, 1>, scalar_prefetch = 0 : i64, scratch_operands = 0 : i64, tpu.core_type = #tpu.core_type<tc>, window_params = [{transform_indices = @transform_0, window_bounds = array<i64: 8, 128>}, {transform_indices = @transform_1, window_bounds = array<i64: 8, 128>}, {transform_indices = @transform_2, window_bounds = array<i64: 1, 3, 8, 128>}]} {
    %c0_i32 = arith.constant 0 : i32
    %0 = arith.cmpi eq, %arg1, %c0_i32 : i32
    %1 = arith.extui %0 : i1 to i32
    %c0_i32_0 = arith.constant 0 : i32
    %2 = arith.cmpi ne, %1, %c0_i32_0 : i32
    scf.if %2 {
      %cst_29 = arith.constant 0.000000e+00 : f32
      %35 = vector.broadcast %cst_29 : f32 to vector<1x3x8x128xf32>
      %c0_30 = arith.constant 0 : index
      %c0_31 = arith.constant 0 : index
      %c0_32 = arith.constant 0 : index
      %c0_33 = arith.constant 0 : index
      %36 = vector.load %arg4[%c0_30, %c0_31, %c0_32, %c0_33] : memref<1x3x8x128xf32, #tpu.memory_space<vmem>>, vector<1x3x8x128xf32>
      tpu.vector_store %arg4[%c0_30, %c0_31, %c0_32, %c0_33], %35 {strides = array<i32>} : memref<1x3x8x128xf32, #tpu.memory_space<vmem>>, vector<1x3x8x128xf32>,
    } else {
    }
    %c0 = arith.constant 0 : index
    %c0_1 = arith.constant 0 : index
    %3 = vector.load %arg2[%c0, %c0_1] : memref<8x128xf32, #tpu.memory_space<vmem>>, vector<8x128xf32>
    %4 = arith.negf %3 : vector<8x128xf32>
    %5 = math.exp %4 : vector<8x128xf32>
    %cst = arith.constant 1.000000e+00 : f32
    %6 = vector.broadcast %cst : f32 to vector<8x128xf32>
    %7 = arith.addf %6, %5 : vector<8x128xf32>
    %8 = arith.divf %6, %7 : vector<8x128xf32>
    %c0_2 = arith.constant 0 : index
    %c0_3 = arith.constant 0 : index
    %9 = vector.load %arg3[%c0_2, %c0_3] : memref<8x128xf32, #tpu.memory_space<vmem>>, vector<8x128xf32>
    %c0_4 = arith.constant 0 : index
    %c0_5 = arith.constant 0 : index
    %c0_6 = arith.constant 0 : index
    %c0_7 = arith.constant 0 : index
    %10 = vector.load %arg4[%c0_4, %c0_5, %c0_6, %c0_7] : memref<1x3x8x128xf32, #tpu.memory_space<vmem>>, vector<1x1x8x128xf32>
    %11 = vector.shape_cast %10 : vector<1x1x8x128xf32> to vector<8x128xf32>
    %12 = arith.mulf %8, %9 : vector<8x128xf32>
    %13 = vector.shape_cast %12 : vector<8x128xf32> to vector<1x8x128xf32>
    %cst_8 = arith.constant dense<0.000000e+00> : vector<8x128xf32>
    %14 = vector.multi_reduction <add>, %13, %cst_8 [0] : vector<1x8x128xf32> to vector<8x128xf32>
    %15 = arith.addf %11, %14 : vector<8x128xf32>
    %c0_9 = arith.constant 0 : index
    %c0_10 = arith.constant 0 : index
    %c0_11 = arith.constant 0 : index
    %c0_12 = arith.constant 0 : index
    %16 = vector.load %arg4[%c0_9, %c0_10, %c0_11, %c0_12] : memref<1x3x8x128xf32, #tpu.memory_space<vmem>>, vector<1x1x8x128xf32>
    %17 = vector.shape_cast %16 : vector<1x1x8x128xf32> to vector<8x128xf32>
    %18 = vector.shape_cast %15 : vector<8x128xf32> to vector<1x1x8x128xf32>
    tpu.vector_store %arg4[%c0_9, %c0_10, %c0_11, %c0_12], %18 {strides = array<i32>} : memref<1x3x8x128xf32, #tpu.memory_space<vmem>>, vector<1x1x8x128xf32>,
    %c0_13 = arith.constant 0 : index
    %c1 = arith.constant 1 : index
    %c0_14 = arith.constant 0 : index
    %c0_15 = arith.constant 0 : index
    %19 = vector.load %arg4[%c0_13, %c1, %c0_14, %c0_15] : memref<1x3x8x128xf32, #tpu.memory_space<vmem>>, vector<1x1x8x128xf32>
    %20 = vector.shape_cast %19 : vector<1x1x8x128xf32> to vector<8x128xf32>
    %21 = vector.shape_cast %8 : vector<8x128xf32> to vector<1x8x128xf32>
    %cst_16 = arith.constant dense<0.000000e+00> : vector<8x128xf32>
    %22 = vector.multi_reduction <add>, %21, %cst_16 [0] : vector<1x8x128xf32> to vector<8x128xf32>
    %23 = arith.addf %20, %22 : vector<8x128xf32>
    %c0_17 = arith.constant 0 : index
    %c1_18 = arith.constant 1 : index
    %c0_19 = arith.constant 0 : index
    %c0_20 = arith.constant 0 : index
    %24 = vector.load %arg4[%c0_17, %c1_18, %c0_19, %c0_20] : memref<1x3x8x128xf32, #tpu.memory_space<vmem>>, vector<1x1x8x128xf32>
    %25 = vector.shape_cast %24 : vector<1x1x8x128xf32> to vector<8x128xf32>
    %26 = vector.shape_cast %23 : vector<8x128xf32> to vector<1x1x8x128xf32>
    tpu.vector_store %arg4[%c0_17, %c1_18, %c0_19, %c0_20], %26 {strides = array<i32>} : memref<1x3x8x128xf32, #tpu.memory_space<vmem>>, vector<1x1x8x128xf32>,
    %c0_21 = arith.constant 0 : index
    %c2 = arith.constant 2 : index
    %c0_22 = arith.constant 0 : index
    %c0_23 = arith.constant 0 : index
    %27 = vector.load %arg4[%c0_21, %c2, %c0_22, %c0_23] : memref<1x3x8x128xf32, #tpu.memory_space<vmem>>, vector<1x1x8x128xf32>
    %28 = vector.shape_cast %27 : vector<1x1x8x128xf32> to vector<8x128xf32>
    %29 = vector.shape_cast %9 : vector<8x128xf32> to vector<1x8x128xf32>
    %cst_24 = arith.constant dense<0.000000e+00> : vector<8x128xf32>
    %30 = vector.multi_reduction <add>, %29, %cst_24 [0] : vector<1x8x128xf32> to vector<8x128xf32>
    %31 = arith.addf %28, %30 : vector<8x128xf32>
    %c0_25 = arith.constant 0 : index
    %c2_26 = arith.constant 2 : index
    %c0_27 = arith.constant 0 : index
    %c0_28 = arith.constant 0 : index
    %32 = vector.load %arg4[%c0_25, %c2_26, %c0_27, %c0_28] : memref<1x3x8x128xf32, #tpu.memory_space<vmem>>, vector<1x1x8x128xf32>
    %33 = vector.shape_cast %32 : vector<1x1x8x128xf32> to vector<8x128xf32>
    %34 = vector.shape_cast %31 : vector<8x128xf32> to vector<1x1x8x128xf32>
    tpu.vector_store %arg4[%c0_25, %c2_26, %c0_27, %c0_28], %34 {strides = array<i32>} : memref<1x3x8x128xf32, #tpu.memory_space<vmem>>, vector<1x1x8x128xf32>,
    return
  }
  func.func @transform_0(%arg0: i32, %arg1: i32) -> (i32, i32) {
    %c1_i32 = arith.constant 1 : i32
    %0 = arith.muli %arg0, %c1_i32 : i32
    %1 = arith.addi %0, %arg1 : i32
    %c0_i32 = arith.constant 0 : i32
    %c0_i32_0 = arith.constant 0 : i32
    return %1, %c0_i32 : i32, i32
  }
  func.func @transform_1(%arg0: i32, %arg1: i32) -> (i32, i32) {
    %c1_i32 = arith.constant 1 : i32
    %0 = arith.muli %arg0, %c1_i32 : i32
    %1 = arith.addi %0, %arg1 : i32
    %c0_i32 = arith.constant 0 : i32
    %c0_i32_0 = arith.constant 0 : i32
    return %1, %c0_i32 : i32, i32
  }
  func.func @transform_2(%arg0: i32, %arg1: i32) -> (i32, i32, i32, i32) {
    %c0_i32 = arith.constant 0 : i32
    %c0_i32_0 = arith.constant 0 : i32
    %c0_i32_1 = arith.constant 0 : i32
    %c0_i32_2 = arith.constant 0 : i32
    return %arg0, %c0_i32, %c0_i32_0, %c0_i32_1 : i32, i32, i32, i32
  }
}

</mosaic_0001>

<bundles_post_ra>
// kernel: tpu_custom_call.1
= control target key start
LH: loop header
LB: loop body
LE: loop exit
PB: predicated region body
PF: predicated region fallthrough
CT: control target
= control target key end

     0   :  { %7 = vsyncpa [#allocation3], 0  ;;  %s774_s0 = inlined_call_operand.hbm [shape: f32[16,128], index: 0, kind: input, shape index: {}]   ;;  %s775_s1 = inlined_call_operand.hbm [shape: f32[16,128], index: 1, kind: input, shape index: {}]   ;;  %s776_s2 = inlined_call_operand.hbm [shape: f32[2,3,8,128], index: 2, kind: output, shape index: {}]  }
   0x1   :  { %9 = vsyncpa [#allocation3 + $0x1], 0 }
   0x2   :  { %10 = vsyncpa [#allocation6], 0 }
   0x3   :  { %12 = vsyncpa [#allocation6 + $0x1], 0 }
   0x4   :  { %13 = vsyncpa [#allocation4], 0 }
   0x5   :  { %15 = vsyncpa [#allocation4 + $0x1], 0  ;;  %s645_s9 = smov 0   ;;  %s647_s10 = smov 0  }
   0x6   :  { %s649_s11 = smov 0   ;;  %s651_s12 = smov 0  }
   0x7   :  { %s653_s13 = smov 0   ;;  %s655_s14 = smov 0  }
   0x8 LB: > { %s385_s15 = sadd.s32 4294967295, %s626_s14   ;;  %s386_s16 = sadd.s32 4294967294, %s626_s14   ;;  %s626_s14 = sphi %s655_s14, %s21_s14   ;;  %s622_s13 = sphi %s653_s13, %s785_s13   ;;  %s618_s12 = sphi %s651_s12, %s784_s12   ;;  %s614_s11 = sphi %s649_s11, %s783_s11   ;;  %s610_s10 = sphi %s647_s10, %s782_s10   ;;  %s606_s9 = sphi %s645_s9, %s781_s9  }
   0x9   : > { %s33_s17 = sadd.s32 1, %s622_s13  ;;  %s42_s18 = sadd.s32 1, %s614_s11 }
   0xa   : > { %p35_p0 = scmp.ge.s32.totalorder %s33_s17, 2  ;;  %p49_p1 = scmp.ne.s32.totalorder %s614_s11, %s610_s10 }
   0xb   : > { %p50_p2 = scmp.eq.s32.totalorder %s626_s14, 0  ;;  %p55_p3 = scmp.ne.s32.totalorder %s610_s10, %s606_s9 }
   0xc   : > { %s787_s17 = smov (%p35_p0, %s33_s17), 0  ;;  %p56_p5 = scmp.eq.s32.totalorder %s385_s15, 0 }
   0xd   : > { %p686_p4 = por %p50_p2, %p49_p1  ;;  %s39_s20 = ssub.s32 %s622_s13, %s787_s17 }
   0xe   : > { %p107_p6 = scmp.eq.s32.totalorder %s385_s15, 1  ;;  %p40_p7 = scmp.eq.s32.totalorder %s39_s20, 0 }
   0xf   : > { %p692_p8 = por %p56_p5, %p55_p3  ;;  %p113_p10 = scmp.eq.s32.totalorder %s386_s16, 1 }
  0x10   : > { %p696_p9 = por %p107_p6, %p49_p1  ;;  %p388_p12 = scmp.ge.s32.totalorder %s626_s14, 2 }
  0x11   : > { %s701_s23 = scalar_select %p40_p7, %s614_s11, %s42_s18  }
  0x12   : > { %p703_p11 = por %p113_p10, %p55_p3  ;;  %p423_p13 = scmp.lt.s32.totalorder %s626_s14, 2 }
  0x13   : > { %s133_s25 = sand.u32 1, %s614_s11   ;;  %s390_s27 = sshll.u32 %s622_s13, 3 }
  0x14   : > { %s389_s26 = sshll.u32 %s133_s25, 3  ;;  %s142_s30 = scalar_lea.hbm %s774_s0, %s390_s27 }
  0x15   : > { %s137_s3 = scalar_lea.vmem [#allocation2], %s389_s26  ;;  %s144_s5 = sshll.u32 %s142_s30, 4  ;;  %s145_s5 = int_to_ptr.hbm [resolvable:$true] %s144_s5 }
  0x16   : > { %s146_s4 = sshll.u32 %s137_s3, 4  ;;  %p413_p0 = pnand %p423_p13, %p686_p4  ;;  %s147_s4 = int_to_ptr.vmem [resolvable:$true] %s146_s4 }
  0x17   : > { %p393_p1 = scmp.ge.s32.totalorder %s626_s14, 1  ;;  %p171_p2 = scmp.lt.s32.totalorder %s626_s14, 3 }
  0x18   : > { %s134_s6 = scalar_lea.sflag [#allocation3], %s133_s25  ;;  %s162_s15 = scalar_lea.hbm %s775_s1, %s390_s27 }
  0x19   : > { %415 = dma.hbm_to_vmem [thread:$0]  (!%p413_p0), %s145_s5, 128, %s147_s4, %s134_s6  }
  0x1a   : > { %p172_p3 = pnand %p393_p1, %p171_p2  ;;  %s157_s16 = scalar_lea.vmem [#allocation5], %s389_s26 }
  0x1b   : > { %s166_s18 = sshll.u32 %s157_s16, 4  ;;  %s164_s20 = sshll.u32 %s162_s15, 4  ;;  %s167_s18 = int_to_ptr.vmem [resolvable:$true] %s166_s18  ;;  %s165_s20 = int_to_ptr.hbm [resolvable:$true] %s164_s20 }
  0x1c   : > { %s154_s28 = scalar_lea.sflag [#allocation6], %s133_s25  ;;  %175 = sbr.rel (%p172_p3) target bundleno = 71 (0x47), region = 28 }
  0x1d   : > { %418 = dma.hbm_to_vmem [thread:$0]  (!%p413_p0), %s165_s20, 128, %s167_s18, %s154_s28  }
  0x1e   : > { %s722_s19 = sand.u32 (!%p172_p3), 1, %s610_s10  }
  0x1f   : > { %s394_s29 = sshll.u32 (!%p172_p3), %s722_s19, 3  ;;  %s178_s30 = scalar_lea.sflag (!%p172_p3), [#allocation3], %s722_s19 }
  0x20   : > { %s181_s3 = scalar_lea.vmem (!%p172_p3), [#allocation2], %s394_s29 }
  0x21   : > { %593 = dma.done.wait (%p692_p8), %s178_s30, 128  }
  0x22   : > { %595 = vsyncadd (%p692_p8), %s178_s30, 4294967168  ;;  %s188_s26 = scalar_lea.sflag [#allocation6], %s722_s19  ;;  %s191_s25 = scalar_lea.vmem [#allocation5], %s394_s29 }
  0x23   : > { %597 = dma.done.wait (%p692_p8), %s188_s26, 128  }
  0x24   : > { %599 = vsyncadd (%p692_p8), %s188_s26, 4294967168  ;;  %s404_s27 = smul.u32 24, %s722_s19  ;;  %v227_v0 = vld [vmem:[%s181_s3] sm:$0xff]  ;;  %v247_v1 = vld [vmem:[%s191_s25] sm:$0xff]  ;;  %s560_s29 = scalar_lea.hbm %s776_s2, 48 }
  0x25   : > { %v396_v2 = vmul.f32 -1.442695, %v227_v0  ;;  %s405_s21 = smul.u32 24, %s618_s12  ;;  %s264_s12 = scalar_lea.sflag [#allocation4], %s722_s19 }
  0x26   : > { %s217_s4 = scalar_lea.vmem [#allocation7], %s404_s27 }
  0x27   : > { %476 = vpow2.f32 %v396_v2  ;;  %400 = vst [vmem:[%s217_s4 + $0x10] sm:$0xff] %v247_v1  ;;  %s275_s7 = scalar_lea.hbm %s776_s2, %s405_s21  ;;  %s276_s8 = sshll.u32 %s217_s4, 4  ;;  %s277_s8 = int_to_ptr.vmem [resolvable:$true] %s276_s8 }
  0x28   : > { %s278_s15 = sshll.u32 %s275_s7, 4  ;;  %s279_s15 = int_to_ptr.hbm [resolvable:$true] %s278_s15 }
  0x29   : > { %s554_s16 = sshra.s32 %s279_s15, 4  ;;  %s555_s16 = int_to_ptr.hbm [resolvable:$true] %s554_s16 }
  0x2a   : > { %s556_s18 = scalar_lea.hbm %s555_s16, 24  ;;  %p561_p7 = scmp.lt.s32.totalorder %s555_s16, %s776_s2 }
  0x2b   : > { %p557_p4 = scmp.ne.s32.totalorder %s555_s16, %s556_s18  ;;  %p562_p8 = scmp.lt.s32.totalorder %s560_s29, %s556_s18 }
  0x2d   : > { %v477_v3 = vpop.eup %476  ;;  %p558_p5 = pnand %p557_p4, %p696_p9  ;;  %p563_p10 = por %p562_p8, %p561_p7 }
  0x2e   : > { %v231_v4 = vadd.f32 1.0, %v477_v3 }
  0x2f   : > { %p559_p6 = pneg %p558_p5 }
  0x30   : > { %478 = vrcp.f32 %v231_v4  ;;  %v243_v7 = vand.u32 2147483648, %v231_v4  ;;  %vm237_vm0 = vweird.f32 %v231_v4  ;;  %v241_v9 = vand.u32 2147483647, %v231_v4 }
  0x31   : > { %p564_p13 = pnand %p563_p10, %p559_p6 }
  0x32   : > { %v244_v11 = vor.u32 1.1754944e-38, %v243_v7  ;;  %vm242_vm3 = vcmp.eq.f32.partialorder %v241_v9, 8.507059e+37 }
  0x36   : > { %v479_v5 = vpop.eup %478 }
  0x37   : > { %v233_v6 = vmul.f32 %v479_v5, %v231_v4  ;;  %vm238_vm1 = vweird.f32 %v479_v5 }
  0x38   : > { %vm239_vm2 = vmor %vm237_vm0, %vm238_vm1 }
  0x39   : > { %v234_v8 = vsub.f32 1.0, %v233_v6 }
  0x3b   : > { %v235_v10 = vmul.f32 %v479_v5, %v234_v8 }
  0x3d   : > { %v236_v12 = vadd.f32 %v479_v5, %v235_v10 }
  0x3f   : > { %v240_v13 = vsel %vm239_vm2, %v479_v5, %v236_v12 }
  0x40   : > { %v245_v14 = vsel %vm242_vm3, %v244_v11, %v240_v13 }
  0x41   : > { %v249_v15 = vmul.f32 %v247_v1, %v245_v14  ;;  %398 = vst [vmem:[%s217_s4 + $0x8] sm:$0xff] %v245_v14 }
  0x43   : > { %252 = vst [vmem:[%s217_s4] sm:$0xff] %v249_v15 }
  0x44   : > { %567 = shalt.err (!%p564_p13)
}
  0x45   : > { %s628_s19 = smov 128   ;;  %s629_s26 = smov 8  }
  0x46   : > { %410 = dma.vmem_to_hbm [thread:$0]  (%p696_p9), %s277_s8, 384, %s279_s15, %s264_s12, %s628_s19, %s628_s19, %s629_s26  }
  0x47 PF: > { %s293_s25 = sand.u32 1, %s606_s9   ;;  %p420_p0 = pnand %p388_p12, %p703_p11 }
  0x48   : > { %s294_s27 = scalar_lea.sflag [#allocation4], %s293_s25 }
  0x49   : > { %p421_p1 = pneg %p420_p0 }
  0x4b   : > { %601 = dma.done.wait (%p421_p1), %s294_s27, 384  }
  0x4c   : > { %603 = vsyncadd (%p421_p1), %s294_s27, 4294966912  ;;  %s21_s14 = sadd.s32 1, %s626_s14   ;;  %s781_s9 = smov %s610_s10 }
  0x4d   : > { %p18_p2 = scmp.ge.s32.totalorder %s21_s14, 4   ;;  %s782_s10 = smov %s614_s11 }
  0x4e   : > { %s783_s11 = smov %s701_s23  ;;  %s784_s12 = smov %s622_s13 }
  0x4f   : > { %s785_s13 = smov %s787_s17  ;;  %20 = sbr.rel (!%p18_p2) target bundleno = 8 (0x8), region = 92 }
  0x54   :  { %300 = vsyncpa [#allocation3], 1 }
  0x55   :  { %302 = vsyncpa [#allocation3 + $0x1], 1 }
  0x56   :  { %303 = vsyncpa [#allocation6], 1 }
  0x57   :  { %305 = vsyncpa [#allocation6 + $0x1], 1 }
  0x58   :  { %306 = vsyncpa [#allocation4], 1 }
  0x59   :  { %308 = vsyncpa [#allocation4 + $0x1], 1 }

</bundles_post_ra>
